<compile_context>
chip_gen: v5e
topology: v5e:2x2
jax: 0.10.0
libtpu: 0.0.40
codegen_flags: <defaults>
</compile_context>

<pallas_src>
from functools import partial

import numpy as np
import jax
import jax.numpy as jnp
from jax.experimental import pallas as pl
from jax.experimental.pallas import tpu as pltpu


def _round_up(x, m):
    return (x + m - 1) // m * m


# --------------------------------------------------------------------------
# Pallas kernel: weighted cross entropy (F.cross_entropy with `weight=`,
# reduction='mean'):  loss = sum_i w[y_i] * (lse(x_i) - x_i[y_i]) / sum_i w[y_i]
# --------------------------------------------------------------------------
def _make_wce_kernel(num_classes, ts, tiles_per_core, rs_pad):
    """Builds the kernel body for static tiling parameters.

    Refs:
      x_ref  : (C, TS, 128)   VMEM, logits in their HBM dtype (f32 or bf16)
      t_ref  : (TS, 128)      VMEM, int8 targets (-1 = padded / ignore)
      w_ref  : (C,)           SMEM, f32 class weights
      out_ref: (1, 2, 8, 128) VMEM f32, per-core per-lane [num, den] partials
               (resident across the "arbitrary" axis -> accumulator)
    """

    def kernel(x_ref, t_ref, w_ref, out_ref):
        core = pl.program_id(0)
        j = pl.program_id(1)

        @pl.when(j == 0)
        def _init():
            out_ref[...] = jnp.zeros_like(out_ref)

        # Logical (un-clamped) row-tile index -> global sublane-row ids, used to
        # mask grid-tail tiles whose DMA'd contents are duplicated / undefined.
        b = core * tiles_per_core + j
        row_ids = b * ts + jax.lax.broadcasted_iota(jnp.int32, (ts, 128), 0)
        valid = row_ids < rs_pad

        tgt = t_ref[...].astype(jnp.int32)                 # (TS, 128)
        rows = [x_ref[c] for c in range(num_classes)]      # dense (TS, 128) slabs

        # Class axis is tiny & static: fully unrolled VPU max / EUP exp.
        # Compute stays in the input dtype (bf16 VPU/EUP on v6e/v7x); num/den
        # accumulation is always f32.
        m = rows[0]
        for c in range(1, num_classes):
            m = jnp.maximum(m, rows[c])
        s = jnp.exp(rows[0] - m).astype(jnp.float32)
        for c in range(1, num_classes):
            s = s + jnp.exp(rows[c] - m).astype(jnp.float32)
        lse = jnp.log(s) + m.astype(jnp.float32)           # (TS, 128) f32

        # One-hot gather of target logit / class weight via selects; labels that
        # match no class (-1 padding, out-of-range) get weight 0 -> no effect.
        tgt_logit = jnp.zeros((ts, 128), dtype=rows[0].dtype)
        wt = jnp.zeros((ts, 128), dtype=jnp.float32)
        for c in range(num_classes):
            match = tgt == c
            tgt_logit = jnp.where(match, rows[c], tgt_logit)
            wt = jnp.where(match, w_ref[c], wt)

        # Tail masking with a select, so NaN/Inf from garbage rows cannot leak.
        wt = jnp.where(valid, wt, 0.0)
        nll_w = jnp.where(valid, (lse - tgt_logit.astype(jnp.float32)) * wt, 0.0)

        # Per-lane partial sums: cross-vreg VPU adds only in the hot loop; the
        # final cross-lane reduction + divide happen in JAX outside the kernel.
        out_ref[0, 0] = out_ref[0, 0] + nll_w.reshape(ts // 8, 8, 128).sum(axis=0)
        out_ref[0, 1] = out_ref[0, 1] + wt.reshape(ts // 8, 8, 128).sum(axis=0)

    return kernel


@partial(jax.jit, static_argnames=("tile_rows", "num_cores"))
def weighted_cross_entropy_pallas(logits, target_classes, class_weight,
                                  *, tile_rows=512, num_cores=2):
    """logits: (B, N, C) float (f32/bf16); target_classes: (B, N) int;
    class_weight: (C,) float.  Semantics of
    F.cross_entropy(logits.view(-1,C), targets.view(-1), weight=w, 'mean')."""
    B, N, C = logits.shape
    R = B * N

    RS = pl.cdiv(R, 128)               # sublane rows of real data
    RS_pad = _round_up(max(RS, 1), 8)  # 8-aligned so (TS,128) vregs are dense
    R_pad = RS_pad * 128

    # Row-tile size (in sublane rows): multiple of 32 (int8 target tiling) or
    # the full row extent.  512 rows = 64K samples/tile keeps per-step overhead
    # negligible while the double-buffered footprint stays ~2 MiB (fits the
    # scoped VMEM default on v5e/v6e/v7x without tuning).
    tile_rows = max(32, _round_up(int(tile_rows), 32))
    TS = min(tile_rows, RS_pad)
    T = pl.cdiv(RS_pad, TS)            # total row tiles
    NC = max(1, int(num_cores))        # "parallel" axis: v7x dual-TC split
    TPC = pl.cdiv(T, NC)               # row tiles per core

    # Class-major lane-dense layout.  The (R,C)->(C,R) relayout is the only
    # non-trivial host-side copy; allow_input_fusion lets XLA fuse it (plus the
    # tiny <=1023-row alignment pad) into the pallas_call input DMA.
    # TODO(synk): ideally the P2PNet classification head would emit pred_logits
    # class-major so no relayout is needed at all.
    x = logits.reshape(R, C)
    t = target_classes.reshape(R).astype(jnp.int8)   # 1 B/row of HBM traffic
    if R_pad != R:
        x = jnp.pad(x, ((0, R_pad - R), (0, 0)))
        t = jnp.pad(t, (0, R_pad - R), constant_values=-1)   # masked rows
    x = jnp.transpose(x, (1, 0)).reshape(C, RS_pad, 128)
    t = t.reshape(RS_pad, 128)
    w = class_weight.astype(jnp.float32)

    kernel = _make_wce_kernel(C, TS, TPC, RS_pad)
    blk = lambda c, j: jnp.minimum(c * TPC + j, T - 1)   # clamp grid-tail tiles

    partials = pl.pallas_call(
        kernel,
        grid=(NC, TPC),
        in_specs=[
            pl.BlockSpec((C, TS, 128), lambda c, j: (0, blk(c, j), 0)),
            pl.BlockSpec((TS, 128), lambda c, j: (blk(c, j), 0)),
            pl.BlockSpec(memory_space=pltpu.MemorySpace.SMEM),   # class weights
        ],
        out_specs=pl.BlockSpec((1, 2, 8, 128), lambda c, j: (c, 0, 0, 0)),
        out_shape=jax.ShapeDtypeStruct((NC, 2, 8, 128), jnp.float32),
        compiler_params=pltpu.CompilerParams(
            dimension_semantics=("parallel", "arbitrary"),
            allow_input_fusion=[True, True, False],
        ),
    )(x, t, w)

    num = jnp.sum(partials[:, 0])
    den = jnp.sum(partials[:, 1])
    # Matches torch semantics: non-finite if the total matched weight is zero.
    return num / den


# --------------------------------------------------------------------------
# SetCriterion_Classification — JAX/Pallas port
# --------------------------------------------------------------------------
class SetCriterionClassificationPallas:
    def __init__(self, matcher, num_classes, eos_coef, ce_coef):
        self.matcher = matcher
        self.num_classes = num_classes
        empty_weight = np.ones((num_classes,), dtype=np.float32)
        empty_weight[0] = eos_coef
        for i, weight in enumerate(ce_coef):
            empty_weight[i + 1] = weight
        self.empty_weight = jnp.asarray(empty_weight)

    def _build_target_classes(self, shape, targets, indices):
        # single fused scatter of all matched GT labels into a dense (B, N) tensor
        B, N = shape
        batch_ids, src_ids, labels = [], [], []
        for b, (src, tgt_i) in enumerate(indices):
            src = np.asarray(src, dtype=np.int32)
            tgt_i = np.asarray(tgt_i, dtype=np.int32)
            if src.size == 0:
                continue
            lab = np.asarray(targets[b]['labels'], dtype=np.int32)[tgt_i]
            batch_ids.append(np.full(src.shape, b, dtype=np.int32))
            src_ids.append(src)
            labels.append(lab)
        tc = jnp.zeros((B, N), dtype=jnp.int32)
        if batch_ids:
            bi = jnp.asarray(np.concatenate(batch_ids))
            si = jnp.asarray(np.concatenate(src_ids))
            la = jnp.asarray(np.concatenate(labels))
            tc = tc.at[bi, si].set(la)
        return tc

    def loss_labels(self, outputs, targets, indices, num_points):
        src_logits = outputs['pred_logits']                 # (B, N, C)
        B, N, _ = src_logits.shape
        target_classes = self._build_target_classes((B, N), targets, indices)
        loss_ce = weighted_cross_entropy_pallas(
            src_logits, target_classes, self.empty_weight)
        return {'loss_ce': loss_ce}

    def forward(self, outputs, regression_outputs, targets):
        regression_outputs = {
            'pred_logits': regression_outputs['pred_logits'],
            'pred_points': regression_outputs['pred_points'],
        }
        indices = self.matcher(regression_outputs, targets)
        num_points = sum(len(t['labels']) for t in targets)
        num_points = jnp.asarray([num_points], dtype=jnp.float32)
        losses = {}
        losses.update(self.loss_labels(outputs, targets, indices, num_points))
        return losses


# --------------------------------------------------------------------------
# Synthetic matcher (the real module injects a Hungarian matcher).
# TODO(synk): Hungarian (linear_sum_assignment) matching has no clean Pallas
# equivalent; a deterministic identity matching is used for this synthetic run.
# --------------------------------------------------------------------------
def identity_matcher(regression_outputs, targets):
    indices = []
    for t in targets:
        n = len(t['labels'])
        idx = np.arange(n, dtype=np.int32)
        indices.append((idx, idx))
    return indices


# --------------------------------------------------------------------------
# Pure-JAX reference (sanity check of the kernel)
# --------------------------------------------------------------------------
def _ref_weighted_ce(logits, target_classes, class_weight):
    B, N, C = logits.shape
    x = logits.reshape(B * N, C).astype(jnp.float32)
    t = target_classes.reshape(B * N)
    logp = jax.nn.log_softmax(x, axis=-1)
    nll = -jnp.take_along_axis(logp, t[:, None], axis=-1)[:, 0]
    wt = class_weight[t]
    return jnp.sum(nll * wt) / jnp.sum(wt)


if __name__ == "__main__":
    key = jax.random.PRNGKey(0)
    B, N, C = 2, 8, 4          # batch, num point proposals, num classes
    k1, k2, k3, k4, k5, k6 = jax.random.split(key, 6)

    pred_logits = jax.random.normal(k1, (B, N, C), dtype=jnp.float32)
    pred_points = jax.random.normal(k2, (B, N, 2), dtype=jnp.float32)

    outputs = {'pred_logits': pred_logits}
    regression_outputs = {'pred_logits': pred_logits, 'pred_points': pred_points}

    # ground-truth targets (labels in [1, C-1]; 0 is background / "no object")
    targets = [
        {'labels': np.array([1, 2, 3], dtype=np.int32),
         'point': np.array([[0.1, 0.2], [0.3, 0.4], [0.5, 0.6]], dtype=np.float32)},
        {'labels': np.array([2, 1], dtype=np.int32),
         'point': np.array([[0.7, 0.8], [0.9, 0.1]], dtype=np.float32)},
    ]

    criterion = SetCriterionClassificationPallas(
        matcher=identity_matcher, num_classes=C, eos_coef=0.5,
        ce_coef=[1.0, 2.0, 1.5])

    losses = criterion.forward(outputs, regression_outputs, targets)
    loss_ce = jax.block_until_ready(losses['loss_ce'])

    # check 1: toy size (single tile) against pure-JAX reference
    indices = identity_matcher(regression_outputs, targets)
    tc = criterion._build_target_classes((B, N), targets, indices)
    ref = jax.block_until_ready(
        _ref_weighted_ce(pred_logits, tc, criterion.empty_weight))
    assert np.allclose(np.asarray(loss_ce), np.asarray(ref),
                       rtol=1e-5, atol=1e-5), (loss_ce, ref)

    # check 2: multi-tile / dual-core accumulation path with masked tail tiles
    # (R = 12000 -> 96 sublane rows, TS = 32 -> grid (2, 2), one clamped+masked tile)
    B2, N2 = 2, 6000
    logits2 = jax.random.normal(k3, (B2, N2, C), dtype=jnp.float32)
    tgt2 = jax.random.randint(k4, (B2, N2), 0, C, dtype=jnp.int32)
    out2 = jax.block_until_ready(
        weighted_cross_entropy_pallas(logits2, tgt2, criterion.empty_weight,
                                      tile_rows=32))
    ref2 = jax.block_until_ready(
        _ref_weighted_ce(logits2, tgt2, criterion.empty_weight))
    assert np.allclose(np.asarray(out2), np.asarray(ref2),
                       rtol=1e-4, atol=1e-5), (out2, ref2)

    # check 3: bf16 logits (typical P2PNet head dtype); bf16 max/sub/exp path
    # in-kernel with f32 num/den accumulation -> loose bf16 tolerance.
    B3, N3, C3 = 2, 1024, 2
    logits3 = jax.random.normal(k5, (B3, N3, C3), dtype=jnp.float32).astype(jnp.bfloat16)
    tgt3 = jax.random.randint(k6, (B3, N3), 0, C3, dtype=jnp.int32)
    w3 = jnp.array([0.5, 1.0], dtype=jnp.float32)
    out3 = jax.block_until_ready(weighted_cross_entropy_pallas(logits3, tgt3, w3))
    ref3 = jax.block_until_ready(_ref_weighted_ce(logits3, tgt3, w3))
    assert np.allclose(np.asarray(out3), np.asarray(ref3),
                       rtol=5e-2, atol=5e-2), (out3, ref3)

    print("KERNEL_OK")
</pallas_src>

<mosaic_0001>
module attributes {stable_mosaic.version = 11 : i64} {
  func.func @kernel(%arg0: i32, %arg1: i32, %arg2: memref<4x8x128xf32, #tpu.memory_space<vmem>>, %arg3: memref<8x128xi8, #tpu.memory_space<vmem>>, %arg4: memref<4xf32, #tpu.memory_space<smem>>, %arg5: memref<1x2x8x128xf32, #tpu.memory_space<vmem>>) attributes {dimension_semantics = [#tpu.dimension_semantics<parallel>, #tpu.dimension_semantics<arbitrary>], iteration_bounds = array<i64: 2, 1>, scalar_prefetch = 0 : i64, scratch_operands = 0 : i64, tpu.core_type = #tpu.core_type<tc>, window_params = [{transform_indices = @transform_0, window_bounds = array<i64: 4, 8, 128>}, {transform_indices = @transform_1, window_bounds = array<i64: 8, 128>}, {transform_indices = @transform_2, window_bounds = array<i64: 4>}, {transform_indices = @transform_3, window_bounds = array<i64: 1, 2, 8, 128>}]} {
    %c0_i32 = arith.constant 0 : i32
    %0 = arith.cmpi eq, %arg1, %c0_i32 : i32
    %1 = arith.extui %0 : i1 to i32
    %c0_i32_0 = arith.constant 0 : i32
    %2 = arith.cmpi ne, %1, %c0_i32_0 : i32
    scf.if %2 {
      %cst_39 = arith.constant 0.000000e+00 : f32
      %85 = vector.broadcast %cst_39 : f32 to vector<1x2x8x128xf32>
      %c0_40 = arith.constant 0 : index
      %c0_41 = arith.constant 0 : index
      %c0_42 = arith.constant 0 : index
      %c0_43 = arith.constant 0 : index
      %86 = vector.load %arg5[%c0_40, %c0_41, %c0_42, %c0_43] : memref<1x2x8x128xf32, #tpu.memory_space<vmem>>, vector<1x2x8x128xf32>
      tpu.vector_store %arg5[%c0_40, %c0_41, %c0_42, %c0_43], %85 {strides = array<i32>} : memref<1x2x8x128xf32, #tpu.memory_space<vmem>>, vector<1x2x8x128xf32>,
    } else {
    }
    %c1_i32 = arith.constant 1 : i32
    %3 = arith.muli %arg0, %c1_i32 : i32
    %4 = arith.addi %3, %arg1 : i32
    %c8_i32 = arith.constant 8 : i32
    %5 = arith.muli %4, %c8_i32 : i32
    %6 = tpu.iota {dimensions = array<i32: 0>} : vector<8x128xi32>
    %7 = vector.broadcast %5 : i32 to vector<8x128xi32>
    %8 = arith.addi %7, %6 : vector<8x128xi32>
    %c8_i32_1 = arith.constant 8 : i32
    %9 = vector.broadcast %c8_i32_1 : i32 to vector<8x128xi32>
    %10 = arith.cmpi slt, %8, %9 : vector<8x128xi32>
    %c0 = arith.constant 0 : index
    %c0_2 = arith.constant 0 : index
    %11 = vector.load %arg3[%c0, %c0_2] : memref<8x128xi8, #tpu.memory_space<vmem>>, vector<8x128xi8>
    %12 = arith.extsi %11 : vector<8x128xi8> to vector<8x128xi32>
    %c0_3 = arith.constant 0 : index
    %c0_4 = arith.constant 0 : index
    %c0_5 = arith.constant 0 : index
    %13 = vector.load %arg2[%c0_3, %c0_4, %c0_5] : memref<4x8x128xf32, #tpu.memory_space<vmem>>, vector<1x8x128xf32>
    %14 = vector.shape_cast %13 : vector<1x8x128xf32> to vector<8x128xf32>
    %c1 = arith.constant 1 : index
    %c0_6 = arith.constant 0 : index
    %c0_7 = arith.constant 0 : index
    %15 = vector.load %arg2[%c1, %c0_6, %c0_7] : memref<4x8x128xf32, #tpu.memory_space<vmem>>, vector<1x8x128xf32>
    %16 = vector.shape_cast %15 : vector<1x8x128xf32> to vector<8x128xf32>
    %c2 = arith.constant 2 : index
    %c0_8 = arith.constant 0 : index
    %c0_9 = arith.constant 0 : index
    %17 = vector.load %arg2[%c2, %c0_8, %c0_9] : memref<4x8x128xf32, #tpu.memory_space<vmem>>, vector<1x8x128xf32>
    %18 = vector.shape_cast %17 : vector<1x8x128xf32> to vector<8x128xf32>
    %c3 = arith.constant 3 : index
    %c0_10 = arith.constant 0 : index
    %c0_11 = arith.constant 0 : index
    %19 = vector.load %arg2[%c3, %c0_10, %c0_11] : memref<4x8x128xf32, #tpu.memory_space<vmem>>, vector<1x8x128xf32>
    %20 = vector.shape_cast %19 : vector<1x8x128xf32> to vector<8x128xf32>
    %21 = arith.maximumf %14, %16 : vector<8x128xf32>
    %22 = arith.maximumf %21, %18 : vector<8x128xf32>
    %23 = arith.maximumf %22, %20 : vector<8x128xf32>
    %24 = arith.subf %14, %23 : vector<8x128xf32>
    %25 = math.exp %24 : vector<8x128xf32>
    %26 = arith.subf %16, %23 : vector<8x128xf32>
    %27 = math.exp %26 : vector<8x128xf32>
    %28 = arith.addf %25, %27 : vector<8x128xf32>
    %29 = arith.subf %18, %23 : vector<8x128xf32>
    %30 = math.exp %29 : vector<8x128xf32>
    %31 = arith.addf %28, %30 : vector<8x128xf32>
    %32 = arith.subf %20, %23 : vector<8x128xf32>
    %33 = math.exp %32 : vector<8x128xf32>
    %34 = arith.addf %31, %33 : vector<8x128xf32>
    %35 = math.log %34 : vector<8x128xf32>
    %36 = arith.addf %35, %23 : vector<8x128xf32>
    %cst = arith.constant 0.000000e+00 : f32
    %37 = vector.broadcast %cst : f32 to vector<8x128xf32>
    %cst_12 = arith.constant 0.000000e+00 : f32
    %38 = vector.broadcast %cst_12 : f32 to vector<8x128xf32>
    %c0_i32_13 = arith.constant 0 : i32
    %39 = vector.broadcast %c0_i32_13 : i32 to vector<8x128xi32>
    %40 = arith.cmpi eq, %12, %39 : vector<8x128xi32>
    %41 = arith.select %40, %14, %37 : vector<8x128xi1>, vector<8x128xf32>
    %c0_14 = arith.constant 0 : index
    %42 = memref.load %arg4[%c0_14] : memref<4xf32, #tpu.memory_space<smem>>
    %43 = vector.broadcast %42 : f32 to vector<8x128xf32>
    %44 = arith.select %40, %43, %38 : vector<8x128xi1>, vector<8x128xf32>
    %c1_i32_15 = arith.constant 1 : i32
    %45 = vector.broadcast %c1_i32_15 : i32 to vector<8x128xi32>
    %46 = arith.cmpi eq, %12, %45 : vector<8x128xi32>
    %47 = arith.select %46, %16, %41 : vector<8x128xi1>, vector<8x128xf32>
    %c1_16 = arith.constant 1 : index
    %48 = memref.load %arg4[%c1_16] : memref<4xf32, #tpu.memory_space<smem>>
    %49 = vector.broadcast %48 : f32 to vector<8x128xf32>
    %50 = arith.select %46, %49, %44 : vector<8x128xi1>, vector<8x128xf32>
    %c2_i32 = arith.constant 2 : i32
    %51 = vector.broadcast %c2_i32 : i32 to vector<8x128xi32>
    %52 = arith.cmpi eq, %12, %51 : vector<8x128xi32>
    %53 = arith.select %52, %18, %47 : vector<8x128xi1>, vector<8x128xf32>
    %c2_17 = arith.constant 2 : index
    %54 = memref.load %arg4[%c2_17] : memref<4xf32, #tpu.memory_space<smem>>
    %55 = vector.broadcast %54 : f32 to vector<8x128xf32>
    %56 = arith.select %52, %55, %50 : vector<8x128xi1>, vector<8x128xf32>
    %c3_i32 = arith.constant 3 : i32
    %57 = vector.broadcast %c3_i32 : i32 to vector<8x128xi32>
    %58 = arith.cmpi eq, %12, %57 : vector<8x128xi32>
    %59 = arith.select %58, %20, %53 : vector<8x128xi1>, vector<8x128xf32>
    %c3_18 = arith.constant 3 : index
    %60 = memref.load %arg4[%c3_18] : memref<4xf32, #tpu.memory_space<smem>>
    %61 = vector.broadcast %60 : f32 to vector<8x128xf32>
    %62 = arith.select %58, %61, %56 : vector<8x128xi1>, vector<8x128xf32>
    %cst_19 = arith.constant 0.000000e+00 : f32
    %63 = vector.broadcast %cst_19 : f32 to vector<8x128xf32>
    %64 = arith.select %10, %62, %63 : vector<8x128xi1>, vector<8x128xf32>
    %65 = arith.subf %36, %59 : vector<8x128xf32>
    %66 = arith.mulf %65, %64 : vector<8x128xf32>
    %cst_20 = arith.constant 0.000000e+00 : f32
    %67 = vector.broadcast %cst_20 : f32 to vector<8x128xf32>
    %68 = arith.select %10, %66, %67 : vector<8x128xi1>, vector<8x128xf32>
    %c0_21 = arith.constant 0 : index
    %c0_22 = arith.constant 0 : index
    %c0_23 = arith.constant 0 : index
    %c0_24 = arith.constant 0 : index
    %69 = vector.load %arg5[%c0_21, %c0_22, %c0_23, %c0_24] : memref<1x2x8x128xf32, #tpu.memory_space<vmem>>, vector<1x1x8x128xf32>
    %70 = vector.shape_cast %69 : vector<1x1x8x128xf32> to vector<8x128xf32>
    %71 = vector.shape_cast %68 : vector<8x128xf32> to vector<1x8x128xf32>
    %cst_25 = arith.constant dense<0.000000e+00> : vector<8x128xf32>
    %72 = vector.multi_reduction <add>, %71, %cst_25 [0] : vector<1x8x128xf32> to vector<8x128xf32>
    %73 = arith.addf %70, %72 : vector<8x128xf32>
    %c0_26 = arith.constant 0 : index
    %c0_27 = arith.constant 0 : index
    %c0_28 = arith.constant 0 : index
    %c0_29 = arith.constant 0 : index
    %74 = vector.load %arg5[%c0_26, %c0_27, %c0_28, %c0_29] : memref<1x2x8x128xf32, #tpu.memory_space<vmem>>, vector<1x1x8x128xf32>
    %75 = vector.shape_cast %74 : vector<1x1x8x128xf32> to vector<8x128xf32>
    %76 = vector.shape_cast %73 : vector<8x128xf32> to vector<1x1x8x128xf32>
    tpu.vector_store %arg5[%c0_26, %c0_27, %c0_28, %c0_29], %76 {strides = array<i32>} : memref<1x2x8x128xf32, #tpu.memory_space<vmem>>, vector<1x1x8x128xf32>,
    %c0_30 = arith.constant 0 : index
    %c1_31 = arith.constant 1 : index
    %c0_32 = arith.constant 0 : index
    %c0_33 = arith.constant 0 : index
    %77 = vector.load %arg5[%c0_30, %c1_31, %c0_32, %c0_33] : memref<1x2x8x128xf32, #tpu.memory_space<vmem>>, vector<1x1x8x128xf32>
    %78 = vector.shape_cast %77 : vector<1x1x8x128xf32> to vector<8x128xf32>
    %79 = vector.shape_cast %64 : vector<8x128xf32> to vector<1x8x128xf32>
    %cst_34 = arith.constant dense<0.000000e+00> : vector<8x128xf32>
    %80 = vector.multi_reduction <add>, %79, %cst_34 [0] : vector<1x8x128xf32> to vector<8x128xf32>
    %81 = arith.addf %78, %80 : vector<8x128xf32>
    %c0_35 = arith.constant 0 : index
    %c1_36 = arith.constant 1 : index
    %c0_37 = arith.constant 0 : index
    %c0_38 = arith.constant 0 : index
    %82 = vector.load %arg5[%c0_35, %c1_36, %c0_37, %c0_38] : memref<1x2x8x128xf32, #tpu.memory_space<vmem>>, vector<1x1x8x128xf32>
    %83 = vector.shape_cast %82 : vector<1x1x8x128xf32> to vector<8x128xf32>
    %84 = vector.shape_cast %81 : vector<8x128xf32> to vector<1x1x8x128xf32>
    tpu.vector_store %arg5[%c0_35, %c1_36, %c0_37, %c0_38], %84 {strides = array<i32>} : memref<1x2x8x128xf32, #tpu.memory_space<vmem>>, vector<1x1x8x128xf32>,
    return
  }
  func.func @transform_0(%arg0: i32, %arg1: i32) -> (i32, i32, i32) {
    %c1_i32 = arith.constant 1 : i32
    %0 = arith.muli %arg0, %c1_i32 : i32
    %1 = arith.addi %0, %arg1 : i32
    %c0_i32 = arith.constant 0 : i32
    %2 = arith.minsi %1, %c0_i32 : i32
    %c0_i32_0 = arith.constant 0 : i32
    %c0_i32_1 = arith.constant 0 : i32
    %c0_i32_2 = arith.constant 0 : i32
    return %c0_i32_0, %2, %c0_i32_1 : i32, i32, i32
  }
  func.func @transform_1(%arg0: i32, %arg1: i32) -> (i32, i32) {
    %c1_i32 = arith.constant 1 : i32
    %0 = arith.muli %arg0, %c1_i32 : i32
    %1 = arith.addi %0, %arg1 : i32
    %c0_i32 = arith.constant 0 : i32
    %2 = arith.minsi %1, %c0_i32 : i32
    %c0_i32_0 = arith.constant 0 : i32
    %c0_i32_1 = arith.constant 0 : i32
    return %2, %c0_i32_0 : i32, i32
  }
  func.func @transform_2(%arg0: i32, %arg1: i32) -> i32 {
    %c0_i32 = arith.constant 0 : i32
    %c0_i32_0 = arith.constant 0 : i32
    return %c0_i32 : i32
  }
  func.func @transform_3(%arg0: i32, %arg1: i32) -> (i32, i32, i32, i32) {
    %c0_i32 = arith.constant 0 : i32
    %c0_i32_0 = arith.constant 0 : i32
    %c0_i32_1 = arith.constant 0 : i32
    %c0_i32_2 = arith.constant 0 : i32
    return %arg0, %c0_i32, %c0_i32_0, %c0_i32_1 : i32, i32, i32, i32
  }
}

</mosaic_0001>

<bundles_post_ra>
// kernel: weighted_cross_entropy_pallas.2
= control target key start
LH: loop header
LB: loop body
LE: loop exit
PB: predicated region body
PF: predicated region fallthrough
CT: control target
= control target key end

     0   :  { %s704_s0 = inlined_call_operand.vmem [shape: f32[4], index: 0, kind: input, shape index: {}]   ;;  %s705_s1 = inlined_call_operand.vmem [shape: f32[1,4,8,128], index: 1, kind: input, shape index: {}]   ;;  %s706_s2 = inlined_call_operand.vmem [shape: s8[16], index: 2, kind: input, shape index: {}]   ;;  %s707_s3 = inlined_call_operand.<no memory space> [shape: s8[], index: 3, kind: input, shape index: {}]   ;;  %s708_s4 = inlined_call_operand.vmem [shape: f32[2,2,8,128], index: 4, kind: output, shape index: {}]  }
   0x1   :  { %v9_v0 = vstv %s707_s3 }
   0x2   :  { %v614_v1 = vshll.u32 %v9_v0, 24 }
   0x4   :  { %v12_v2 = vshra.s32 %v614_v1, 24 }
   0x5   :  { %13 = vsyncpa [#allocation8], 0  ;;  %s617_s17 = smov 0   ;;  %s619_s18 = smov 0  }
   0x6   :  { %s621_s19 = smov 0  }
   0x7 LB: > { %s467_s3 = sadd.s32 4294967295, %s583_s19   ;;  %s31_s20 = sadd.s32 1, %s579_s18  ;;  %s583_s19 = sphi %s621_s19, %s19_s19   ;;  %s579_s18 = sphi %s619_s18, %s710_s18   ;;  %s575_s17 = sphi %s617_s17, %s709_s17  }
   0x8   : > { %p33_p0 = scmp.ge.s32.totalorder %s31_s20, 2  ;;  %p469_p1 = scmp.ge.s32.totalorder %s583_s19, 1 }
   0x9   : > { %p147_p2 = scmp.lt.s32.totalorder %s583_s19, 3  ;;  %p504_p4 = scmp.eq.s32.totalorder %s467_s3, 0 }
   0xa   : > { %s712_s20 = smov (%p33_p0, %s31_s20), 0  ;;  %s159_s23 = sshll.u32 %s704_s0, 4  ;;  %s160_s23 = int_to_ptr.vmem [resolvable:$true] %s159_s23 }
   0xb   : > { %p148_p3 = pnand %p469_p1, %p147_p2  ;;  %s585_s24 = smov [#allocation7]  }
   0xd   : > { %p500_p5 = pneg %p148_p3  ;;  %199 = sbr.rel (%p148_p3) target bundleno = 71 (0x47), region = 32 }
   0xf   : > { %p501_p6 = pnand %p504_p4, %p500_p5 }
  0x11   : > { %503 = dma.vmem_to_smem (!%p501_p6), %s160_s23, 16, %s585_s24, [#allocation8]  }
  0x12   : > { %570 = dma.done.wait (%p504_p4), [#allocation8], 16  }
  0x13   : > { %572 = vsyncadd (%p504_p4), [#allocation8], 4294967280 }
  0x14   : > { %206 = sfence }
  0x15   : > { %p235_p7 = scmp.lt.s32.totalorder %s575_s17, 0  ;;  %v296_v3 = vlaneseq  ;;  %s351_s12 = sld [smem:[#allocation7]] }
  0x16   : > { %s675_s13 = sld [smem:[#allocation7 + $0x1]]  ;;  %s487_s15 = sshll.u32 %s575_s17, 3 }
  0x17   : > { %s236_s25 = scalar_select %p235_p7, %s575_s17, 0  ;;  %v315_v30 = vshrl.u32 %v296_v3, 7  ;;  %v316_v32 = vstv %s487_s15 }
  0x18   : > { %s677_s14 = sld [smem:[#allocation7 + $0x2]]  ;;  %p255_p9 = scmp.lt.s32.totalorder %s575_s17, 1 }
  0x19   : > { %s238_s26 = scalar_select %p235_p7, %s236_s25, 0  ;;  %v317_v37 = vadd.s32 %v316_v32, %v315_v30 }
  0x1a   : > { %s282_s27 = ssub.s32 0, %s236_s25  ;;  %s486_s6 = sshll.u32 %s236_s25, 10 }
  0x1b   : > { %s477_s28 = sshll.u32 %s238_s26, 3  ;;  %p283_p8 = scmp.lt.s32.totalorder %s282_s27, 0  ;;  %v297_v7 = vstv %s486_s6  ;;  %v292_v10 = vstv %s282_s27  ;;  %v352_v39 = vstv %s351_s12  ;;  %vm318_vm6 = vcmp.lt.s32.totalorder %v317_v37, 8 }
  0x1c   : > { %s240_s5 = scalar_lea.vmem %s705_s1, %s477_s28  ;;  %s250_s9 = scalar_lea.vmem %s706_s2, %s238_s26  ;;  %v298_v11 = vadd.s32 %v297_v7, %v296_v3  ;;  %vm293_vm0 = vcmp.lt.s32.totalorder %v292_v10, 0  ;;  %v357_v41 = vstv %s675_s13 }
  0x1d   : > { %v646_v4 = vld [vmem:[%s240_s5] sm:$0xff]  ;;  %v648_v5 = vld [vmem:[%s240_s5 + $0x8] sm:$0xff]  ;;  %v650_v6 = vld [vmem:[%s240_s5 + $0x10] sm:$0xff]  ;;  %s284_s10 = scalar_select %p283_p8, 0, 255 }
  0x1e   : > { %v328_v8 = vmax.f32 %v646_v4, %v648_v5  ;;  %v657_v9 = vld [vmem:[%s240_s5 + $0x18] sm:$0xff]  ;;  %vm299_vm1 = vcmp.lt.s32.totalorder %v298_v11, 16  ;;  %s680_s16 = sld [smem:[#allocation7 + $0x3]]  ;;  %s714_s17 = smov (!%p255_p9, %s575_s17), 1  ;;  %v362_v42 = vstv %s677_s14 }
  0x1f   : > { %s285_s11 = sand.u32 15, %s284_s10  ;;  %s495_s3 = sshll.u32 %s714_s17, 4 }
  0x20   : > { %v329_v12 = vmax.f32 %v328_v8, %v650_v6  ;;  %v286_v13 = vld [vmem:[%s250_s9] ss:$0 sm:%s285_s11]  ;;  %s259_s23 = scalar_lea.vmem %s708_s4, %s495_s3 }
  0x21   : > { %v287_v15 = vunpack.c.0.s8 %v286_v13 }
  0x22   : > { %v661_v14 = vmax.f32 %v329_v12, %v657_v9 }
  0x23   : > { %v294_v20 = vsel %vm293_vm0, %v12_v2, %v287_v15 }
  0x24   : > { %v331_v16 = vsub.f32 %v646_v4, %v661_v14  ;;  %v334_v17 = vsub.f32 %v648_v5, %v661_v14  ;;  %v338_v18 = vsub.f32 %v650_v6, %v661_v14  ;;  %v342_v19 = vsub.f32 %v657_v9, %v661_v14 }
  0x25   : > { %v300_v21 = vsel %vm299_vm1, %v294_v20, %v12_v2  ;;  %v367_v43 = vstv %s680_s16 }
  0x26   : > { %v332_v22 = vmul.f32 1.442695, %v331_v16  ;;  %v335_v23 = vmul.f32 1.442695, %v334_v17  ;;  %v339_v24 = vmul.f32 1.442695, %v338_v18 }
  0x27   : > { %v303_v25 = vpack.c.b16 0, %v300_v21  ;;  %v343_v26 = vmul.f32 1.442695, %v342_v19 }
  0x28   : > { %532 = vpow2.f32 %v332_v22 }
  0x29   : > { %v304_v27 = vpack.c.b8 0, %v303_v25  ;;  %534 = vpow2.f32 %v335_v23 }
  0x2a   : > { %536 = vpow2.f32 %v339_v24 }
  0x2b   : > { %305 = vst [vmem:[#allocation10] sm:$0x3] %v304_v27  ;;  %538 = vpow2.f32 %v343_v26 }
  0x2e   : > { %v533_v28 = vpop.eup %532 }
  0x2f   : > { %v535_v29 = vpop.eup %534 }
  0x30   : > { %v537_v31 = vpop.eup %536  ;;  %v337_v33 = vadd.f32 %v535_v29, %v533_v28 }
  0x31   : > { %v539_v34 = vpop.eup %538 }
  0x32   : > { %v319_v35 = vld [vmem:[#allocation10] sm:$0x3]  ;;  %v341_v36 = vadd.f32 %v537_v31, %v337_v33 }
  0x33   : > { %v320_v38 = vunpack.c.0.s8 %v319_v35 }
  0x34   : > { %v345_v40 = vadd.f32 %v539_v34, %v341_v36 }
  0x35   : > { %vm349_vm2 = vcmp.eq.s32.totalorder %v320_v38, 0  ;;  %vm354_vm3 = vcmp.eq.s32.totalorder %v320_v38, 1  ;;  %vm359_vm4 = vcmp.eq.s32.totalorder %v320_v38, 2  ;;  %vm364_vm5 = vcmp.eq.s32.totalorder %v320_v38, 3 }
  0x36   : > { %540 = vlog2.f32 %v345_v40  ;;  %v350_v44 = vsel %vm349_vm2, %v646_v4, 0.0  ;;  %v353_v45 = vsel %vm349_vm2, %v352_v39, 0.0 }
  0x37   : > { %v358_v46 = vsel %vm354_vm3, %v357_v41, %v353_v45  ;;  %v355_v47 = vsel %vm354_vm3, %v648_v5, %v350_v44 }
  0x38   : > { %v363_v48 = vsel %vm359_vm4, %v362_v42, %v358_v46  ;;  %v360_v51 = vsel %vm359_vm4, %v650_v6, %v355_v47 }
  0x39   : > { %v368_v49 = vsel %vm364_vm5, %v367_v43, %v363_v48  ;;  %v365_v54 = vsel %vm364_vm5, %v657_v9, %v360_v51 }
  0x3a   : > { %v369_v50 = vsel %vm318_vm6, %v368_v49, 0.0 }
  0x3b   : > { %492 = vst [vmem:[%s259_s23 + $0x8] sm:$0xff] %v369_v50 }
  0x3c   : > { %v541_v52 = vpop.eup %540 }
  0x3d   : > { %v347_v53 = vmul.f32 0.6931472, %v541_v52 }
  0x3f   : > { %v348_v55 = vadd.f32 %v347_v53, %v661_v14 }
  0x41   : > { %v370_v56 = vsub.f32 %v348_v55, %v365_v54 }
  0x43   : > { %v371_v57 = vmul.f32 %v370_v56, %v369_v50 }
  0x45   : > { %v372_v58 = vsel %vm318_vm6, %v371_v57, 0.0 }
  0x46   : > { %376 = vst [vmem:[%s259_s23] sm:$0xff] %v372_v58 }
  0x47 PF: > { %s19_s19 = sadd.s32 1, %s583_s19   ;;  %s709_s17 = smov %s579_s18 }
  0x48   : > { %p16_p10 = scmp.ge.s32.totalorder %s19_s19, 4   ;;  %s710_s18 = smov %s712_s20 }
  0x4a   :  { %18 = sbr.rel (!%p16_p10) target bundleno = 7 (0x7), region = 84 }
  0x4f   :  { %403 = vsyncpa [#allocation8], 1 }
  0x50   :  { %405 = vsyncpa [#allocation8 + $0x1], 1 }

</bundles_post_ra>
